<compile_context>
chip_gen: v6e
topology: v6e:2x2x1
jax: 0.10.0
libtpu: 0.0.40
codegen_flags: <defaults>
</compile_context>

<pallas_src>
import jax
import jax.numpy as jnp
from jax.experimental import pallas as pl
from jax.experimental.pallas import tpu as pltpu


_NEG_INF = -1e30  # finite "minus infinity" used to mask padded actor lanes


def _round_up(n: int, m: int) -> int:
    return ((n + m - 1) // m) * m


def _make_policy_kernel(num_layers: int, mxu_dtype):
    """Kernel computing the full MLP + softmax for one batch tile.

    Ref order: x_ref, (w0, b0, w1, b1, ..., w_actor, b_actor), out_ref
    Weights arrive in mxu_dtype (bf16); biases in f32; accumulation in f32.
    """

    def kernel(*refs):
        x_ref = refs[0]
        out_ref = refs[-1]
        params = refs[1:-1]

        h = x_ref[...]  # (tile_b, F_pad), already mxu_dtype

        # Hidden layers: MXU matmul (bf16 in, f32 acc) + f32 bias/ReLU on VPU.
        for i in range(num_layers):
            w = params[2 * i][...]                 # (in_pad, H_pad) mxu_dtype
            b = params[2 * i + 1][...]             # (1, H_pad) f32
            z = jnp.dot(h, w, preferred_element_type=jnp.float32) + b
            z = jnp.maximum(z, 0.0)                # f32 elementwise
            h = z.astype(mxu_dtype)                # re-feed MXU in bf16

        # Actor head (lane-padded to 128; padded lanes carry a -1e30 bias so
        # they underflow to exactly 0 in the softmax).
        wa = params[2 * num_layers][...]
        ba = params[2 * num_layers + 1][...]
        logits = jnp.dot(h, wa, preferred_element_type=jnp.float32) + ba

        # softmax over the action axis (last axis), all f32.
        m = jnp.max(logits, axis=1, keepdims=True)
        e = jnp.exp(logits - m)
        s = jnp.sum(e, axis=1, keepdims=True)
        # Reciprocal on the EUP slot + one Newton step -> near-exact 1/s.
        r = pl.reciprocal(s, approx=True)
        r = r * (2.0 - s * r)
        out_ref[...] = (e * r).astype(out_ref.dtype)

    return kernel


def prepare_params(params, num_layers: int, mxu_dtype=jnp.bfloat16):
    """One-time param prep: pad F/H/A to multiples of 128, cast weights.

    params: flat list [w0,b0,...,wA,bA]; weights (in_dim, out_dim), biases
    (1, out_dim), all float32.  Returns (call_params, meta).
    """
    F = params[0].shape[0]
    H = params[0].shape[1]
    A = params[-1].shape[-1]
    F_pad = _round_up(F, 128)
    H_pad = _round_up(H, 128)
    A_pad = _round_up(A, 128)

    call_params = []
    for i in range(num_layers):
        w = params[2 * i]
        b = params[2 * i + 1]
        in_pad = F_pad if i == 0 else H_pad
        w = jnp.pad(w, ((0, in_pad - w.shape[0]), (0, H_pad - w.shape[1])))
        b = jnp.pad(b, ((0, 0), (0, H_pad - b.shape[1])))
        call_params += [w.astype(mxu_dtype), b.astype(jnp.float32)]

    wa = params[2 * num_layers]
    ba = params[2 * num_layers + 1]
    wa = jnp.pad(wa, ((0, H_pad - wa.shape[0]), (0, A_pad - wa.shape[1])))
    ba = jnp.pad(ba, ((0, 0), (0, A_pad - ba.shape[1])),
                 constant_values=_NEG_INF)
    call_params += [wa.astype(mxu_dtype), ba.astype(jnp.float32)]

    meta = dict(num_layers=num_layers, F=F, F_pad=F_pad, A=A, A_pad=A_pad,
                mxu_dtype=mxu_dtype)
    return call_params, meta


def policy_forward(x, prepared, *, tile_b: int | None = None,
                   out_dtype=jnp.float32):
    """x: (B, F) float32.  prepared: output of prepare_params()."""
    call_params, meta = prepared
    B, F = x.shape
    assert F == meta["F"], (F, meta["F"])
    F_pad, A, A_pad = meta["F_pad"], meta["A"], meta["A_pad"]

    # ---- Batch tiling: big tiles (cap 512, multiple of 8/128/256). --------
    if tile_b is None:
        tile_b = min(512, _round_up(B, 8))
    B_pad = _round_up(B, tile_b)

    # Single fused pad (+ cast) covering batch padding and feature padding.
    xp = x
    if B_pad != B or F_pad != F:
        xp = jnp.pad(x, ((0, B_pad - B), (0, F_pad - F)))
    xp = xp.astype(meta["mxu_dtype"])

    grid = (B_pad // tile_b,)

    # X / out tiled over batch; weights/biases as full-array blocks with a
    # constant index_map (DMA'd once; total footprint ~100 KB << VMEM).
    in_specs = [pl.BlockSpec((tile_b, F_pad), lambda i: (i, 0))]
    for p in call_params:
        in_specs.append(pl.BlockSpec(p.shape, lambda i: (0, 0)))
    out_spec = pl.BlockSpec((tile_b, A_pad), lambda i: (i, 0))

    out = pl.pallas_call(
        _make_policy_kernel(meta["num_layers"], meta["mxu_dtype"]),
        out_shape=jax.ShapeDtypeStruct((B_pad, A_pad), out_dtype),
        grid=grid,
        in_specs=in_specs,
        out_specs=out_spec,
        compiler_params=pltpu.CompilerParams(
            dimension_semantics=("parallel",),
        ),
    )(xp, *call_params)

    # Strip batch padding and the padded action lanes.
    return out[:B, :A]


def init_params(key, num_features, num_actions, num_layers, hidden_sizes):
    """Deterministic synthetic init matching nn.Linear shapes.

    Weights stored transposed relative to PyTorch: (in_dim, out_dim).
    Biases stored as (1, out_dim) for TPU-friendly 2D layout.
    """
    dims = [num_features] + [hidden_sizes] * num_layers + [num_actions]
    params = []
    for i in range(len(dims) - 1):
        key, kw, kb = jax.random.split(key, 3)
        fan_in = dims[i]
        bound = 1.0 / jnp.sqrt(fan_in)
        w = jax.random.uniform(kw, (dims[i], dims[i + 1]), jnp.float32, -bound, bound)
        b = jax.random.uniform(kb, (1, dims[i + 1]), jnp.float32, -bound, bound)
        params += [w, b]
    return params


def reference_forward(x, params, num_layers):
    h = x
    for i in range(num_layers):
        h = jnp.maximum(h @ params[2 * i] + params[2 * i + 1], 0.0)
    logits = h @ params[2 * num_layers] + params[2 * num_layers + 1]
    return jax.nn.softmax(logits, axis=1)


if __name__ == "__main__":
    num_features = 32
    num_actions = 8
    num_layers = 2          # -> 2 hidden Linear+ReLU layers, matching __init__
    hidden_sizes = 64
    batch = 16

    key = jax.random.PRNGKey(0)
    kx, kp = jax.random.split(key)
    x = jax.random.normal(kx, (batch, num_features), dtype=jnp.float32)
    params = init_params(kp, num_features, num_actions, num_layers, hidden_sizes)

    # One-time (hoisted) padding + bf16 cast of the parameters.
    prepared = prepare_params(params, num_layers, mxu_dtype=jnp.bfloat16)

    policy = policy_forward(x, prepared)
    policy = jax.block_until_ready(policy)

    ref = reference_forward(x, params, num_layers)
    assert policy.shape == (batch, num_actions)
    # Tolerance accommodates bf16 MXU inputs (f32 accumulation) vs f32 reference.
    assert jnp.allclose(policy, ref, atol=5e-3, rtol=5e-3), float(
        jnp.max(jnp.abs(policy - ref)))
    # Rows sum to 1 (Newton-refined reciprocal; padded lanes contribute 0).
    assert jnp.allclose(jnp.sum(policy, axis=1), jnp.ones((batch,)), atol=1e-3)

    print("KERNEL_OK")
</pallas_src>

<mosaic_0001>
module attributes {stable_mosaic.version = 11 : i64} {
  func.func @kernel(%arg0: i32, %arg1: memref<16x128xbf16, #tpu.memory_space<vmem>>, %arg2: memref<128x128xbf16, #tpu.memory_space<vmem>>, %arg3: memref<1x128xf32, #tpu.memory_space<vmem>>, %arg4: memref<128x128xbf16, #tpu.memory_space<vmem>>, %arg5: memref<1x128xf32, #tpu.memory_space<vmem>>, %arg6: memref<128x128xbf16, #tpu.memory_space<vmem>>, %arg7: memref<1x128xf32, #tpu.memory_space<vmem>>, %arg8: memref<16x128xf32, #tpu.memory_space<vmem>>) attributes {dimension_semantics = [#tpu.dimension_semantics<parallel>], iteration_bounds = array<i64: 1>, scalar_prefetch = 0 : i64, scratch_operands = 0 : i64, tpu.core_type = #tpu.core_type<tc>, window_params = [{transform_indices = @transform_0, window_bounds = array<i64: 16, 128>}, {pipeline_mode = #tpu.pipeline_mode<synchronous>, transform_indices = @transform_1, window_bounds = array<i64: 128, 128>}, {pipeline_mode = #tpu.pipeline_mode<synchronous>, transform_indices = @transform_2, window_bounds = array<i64: 1, 128>}, {pipeline_mode = #tpu.pipeline_mode<synchronous>, transform_indices = @transform_3, window_bounds = array<i64: 128, 128>}, {pipeline_mode = #tpu.pipeline_mode<synchronous>, transform_indices = @transform_4, window_bounds = array<i64: 1, 128>}, {pipeline_mode = #tpu.pipeline_mode<synchronous>, transform_indices = @transform_5, window_bounds = array<i64: 128, 128>}, {pipeline_mode = #tpu.pipeline_mode<synchronous>, transform_indices = @transform_6, window_bounds = array<i64: 1, 128>}, {transform_indices = @transform_7, window_bounds = array<i64: 16, 128>}]} {
    %c0 = arith.constant 0 : index
    %c0_0 = arith.constant 0 : index
    %0 = vector.load %arg1[%c0, %c0_0] : memref<16x128xbf16, #tpu.memory_space<vmem>>, vector<16x128xbf16>
    %c0_1 = arith.constant 0 : index
    %c0_2 = arith.constant 0 : index
    %1 = vector.load %arg2[%c0_1, %c0_2] : memref<128x128xbf16, #tpu.memory_space<vmem>>, vector<128x128xbf16>
    %c0_3 = arith.constant 0 : index
    %c0_4 = arith.constant 0 : index
    %2 = vector.load %arg3[%c0_3, %c0_4] : memref<1x128xf32, #tpu.memory_space<vmem>>, vector<1x128xf32>
    %cst = arith.constant dense<0.000000e+00> : vector<16x128xf32>
    %3 = tpu.matmul %0, %1, %cst {dimension_numbers = #tpu.dot_dimension_numbers<[1], [0], [0], [1], [0, 0, 1, 1], [], []>} : vector<16x128xbf16>, vector<128x128xbf16>, vector<16x128xf32> -> vector<16x128xf32>
    %4 = vector.broadcast %2 : vector<1x128xf32> to vector<16x128xf32>
    %5 = arith.addf %3, %4 : vector<16x128xf32>
    %cst_5 = arith.constant 0.000000e+00 : f32
    %6 = vector.broadcast %cst_5 : f32 to vector<16x128xf32>
    %7 = arith.maximumf %5, %6 : vector<16x128xf32>
    %8 = arith.truncf %7 : vector<16x128xf32> to vector<16x128xbf16>
    %c0_6 = arith.constant 0 : index
    %c0_7 = arith.constant 0 : index
    %9 = vector.load %arg4[%c0_6, %c0_7] : memref<128x128xbf16, #tpu.memory_space<vmem>>, vector<128x128xbf16>
    %c0_8 = arith.constant 0 : index
    %c0_9 = arith.constant 0 : index
    %10 = vector.load %arg5[%c0_8, %c0_9] : memref<1x128xf32, #tpu.memory_space<vmem>>, vector<1x128xf32>
    %cst_10 = arith.constant dense<0.000000e+00> : vector<16x128xf32>
    %11 = tpu.matmul %8, %9, %cst_10 {dimension_numbers = #tpu.dot_dimension_numbers<[1], [0], [0], [1], [0, 0, 1, 1], [], []>} : vector<16x128xbf16>, vector<128x128xbf16>, vector<16x128xf32> -> vector<16x128xf32>
    %12 = vector.broadcast %10 : vector<1x128xf32> to vector<16x128xf32>
    %13 = arith.addf %11, %12 : vector<16x128xf32>
    %cst_11 = arith.constant 0.000000e+00 : f32
    %14 = vector.broadcast %cst_11 : f32 to vector<16x128xf32>
    %15 = arith.maximumf %13, %14 : vector<16x128xf32>
    %16 = arith.truncf %15 : vector<16x128xf32> to vector<16x128xbf16>
    %c0_12 = arith.constant 0 : index
    %c0_13 = arith.constant 0 : index
    %17 = vector.load %arg6[%c0_12, %c0_13] : memref<128x128xbf16, #tpu.memory_space<vmem>>, vector<128x128xbf16>
    %c0_14 = arith.constant 0 : index
    %c0_15 = arith.constant 0 : index
    %18 = vector.load %arg7[%c0_14, %c0_15] : memref<1x128xf32, #tpu.memory_space<vmem>>, vector<1x128xf32>
    %cst_16 = arith.constant dense<0.000000e+00> : vector<16x128xf32>
    %19 = tpu.matmul %16, %17, %cst_16 {dimension_numbers = #tpu.dot_dimension_numbers<[1], [0], [0], [1], [0, 0, 1, 1], [], []>} : vector<16x128xbf16>, vector<128x128xbf16>, vector<16x128xf32> -> vector<16x128xf32>
    %20 = vector.broadcast %18 : vector<1x128xf32> to vector<16x128xf32>
    %21 = arith.addf %19, %20 : vector<16x128xf32>
    %cst_17 = arith.constant dense<0xFF800000> : vector<16xf32>
    %22 = vector.multi_reduction <maximumf>, %21, %cst_17 [1] : vector<16x128xf32> to vector<16xf32>
    %23 = vector.shape_cast %22 : vector<16xf32> to vector<16x1xf32>
    %24 = vector.broadcast %23 : vector<16x1xf32> to vector<16x128xf32>
    %25 = arith.subf %21, %24 : vector<16x128xf32>
    %26 = math.exp %25 : vector<16x128xf32>
    %cst_18 = arith.constant dense<0.000000e+00> : vector<16xf32>
    %27 = vector.multi_reduction <add>, %26, %cst_18 [1] : vector<16x128xf32> to vector<16xf32>
    %28 = vector.shape_cast %27 : vector<16xf32> to vector<16x1xf32>
    %29 = tpu.reciprocal %28 {approx = true} : vector<16x1xf32> -> vector<16x1xf32>
    %30 = arith.mulf %28, %29 : vector<16x1xf32>
    %cst_19 = arith.constant 2.000000e+00 : f32
    %31 = vector.broadcast %cst_19 : f32 to vector<16x1xf32>
    %32 = arith.subf %31, %30 : vector<16x1xf32>
    %33 = arith.mulf %29, %32 : vector<16x1xf32>
    %34 = vector.broadcast %33 : vector<16x1xf32> to vector<16x128xf32>
    %35 = arith.mulf %26, %34 : vector<16x128xf32>
    %c0_20 = arith.constant 0 : index
    %c0_21 = arith.constant 0 : index
    %36 = vector.load %arg8[%c0_20, %c0_21] : memref<16x128xf32, #tpu.memory_space<vmem>>, vector<16x128xf32>
    tpu.vector_store %arg8[%c0_20, %c0_21], %35 {strides = array<i32>} : memref<16x128xf32, #tpu.memory_space<vmem>>, vector<16x128xf32>,
    return
  }
  func.func @transform_0(%arg0: i32) -> (i32, i32) {
    %c0_i32 = arith.constant 0 : i32
    %c0_i32_0 = arith.constant 0 : i32
    return %arg0, %c0_i32 : i32, i32
  }
  func.func @transform_1(%arg0: i32) -> (i32, i32) {
    %c0_i32 = arith.constant 0 : i32
    %c0_i32_0 = arith.constant 0 : i32
    %c0_i32_1 = arith.constant 0 : i32
    return %c0_i32, %c0_i32_0 : i32, i32
  }
  func.func @transform_2(%arg0: i32) -> (i32, i32) {
    %c0_i32 = arith.constant 0 : i32
    %c0_i32_0 = arith.constant 0 : i32
    %c0_i32_1 = arith.constant 0 : i32
    return %c0_i32, %c0_i32_0 : i32, i32
  }
  func.func @transform_3(%arg0: i32) -> (i32, i32) {
    %c0_i32 = arith.constant 0 : i32
    %c0_i32_0 = arith.constant 0 : i32
    %c0_i32_1 = arith.constant 0 : i32
    return %c0_i32, %c0_i32_0 : i32, i32
  }
  func.func @transform_4(%arg0: i32) -> (i32, i32) {
    %c0_i32 = arith.constant 0 : i32
    %c0_i32_0 = arith.constant 0 : i32
    %c0_i32_1 = arith.constant 0 : i32
    return %c0_i32, %c0_i32_0 : i32, i32
  }
  func.func @transform_5(%arg0: i32) -> (i32, i32) {
    %c0_i32 = arith.constant 0 : i32
    %c0_i32_0 = arith.constant 0 : i32
    %c0_i32_1 = arith.constant 0 : i32
    return %c0_i32, %c0_i32_0 : i32, i32
  }
  func.func @transform_6(%arg0: i32) -> (i32, i32) {
    %c0_i32 = arith.constant 0 : i32
    %c0_i32_0 = arith.constant 0 : i32
    %c0_i32_1 = arith.constant 0 : i32
    return %c0_i32, %c0_i32_0 : i32, i32
  }
  func.func @transform_7(%arg0: i32) -> (i32, i32) {
    %c0_i32 = arith.constant 0 : i32
    %c0_i32_0 = arith.constant 0 : i32
    return %arg0, %c0_i32 : i32, i32
  }
}

</mosaic_0001>

<bundles_post_ra>
// kernel: tpu_custom_call.1
= control target key start
LH: loop header
LB: loop body
LE: loop exit
PB: predicated region body
PF: predicated region fallthrough
CT: control target
= control target key end

     0   :  { %12 = vsyncpa [#allocation3], 0  ;;  %s862_s0 = inlined_call_operand.hbm [shape: bf16[16,128], index: 0, kind: input, shape index: {}]   ;;  %s863_s1 = inlined_call_operand.hbm [shape: bf16[128,128], index: 1, kind: input, shape index: {}]   ;;  %s864_s2 = inlined_call_operand.vmem [shape: f32[1,128], index: 2, kind: input, shape index: {}]   ;;  %s865_s3 = inlined_call_operand.hbm [shape: bf16[128,128], index: 3, kind: input, shape index: {}]   ;;  %s866_s4 = inlined_call_operand.vmem [shape: f32[1,128], index: 4, kind: input, shape index: {}]   ;;  %s867_s5 = inlined_call_operand.hbm [shape: bf16[128,128], index: 5, kind: input, shape index: {}]   ;;  %s868_s6 = inlined_call_operand.vmem [shape: f32[1,128], index: 6, kind: input, shape index: {}]   ;;  %s869_s7 = inlined_call_operand.hbm [shape: f32[16,128], index: 7, kind: output, shape index: {}]  }
   0x1   :  { %13 = vsyncpa [#allocation6], 0 }
   0x2   :  { %14 = vsyncpa [#allocation9], 0 }
   0x3   :  { %15 = vsyncpa [#allocation4], 0  ;;  %s745_s24 = smov [#allocation5]   ;;  %s746_s26 = smov [#allocation2]  }
   0x4   :  { %s33_s25 = sshll.u32 %s745_s24, 4  ;;  %s21_s27 = sshll.u32 %s746_s26, 4  ;;  %s34_s25 = int_to_ptr.vmem [resolvable:$true] %s33_s25  ;;  %s22_s27 = int_to_ptr.vmem [resolvable:$true] %s21_s27 }
   0x5   :  { %s645_s28 = scalar_lea.vmem %s34_s25, 1024  ;;  %p650_p1 = scmp.lt.s32.totalorder %s34_s25, %s34_s25 }
   0x6   :  { %p646_p0 = scmp.ne.s32.totalorder %s34_s25, %s645_s28  ;;  %p651_p2 = scmp.lt.s32.totalorder %s645_s28, %s645_s28 }
   0x8   :  { %p652_p3 = por %p651_p2, %p650_p1 }
   0xa   :  { %p653_p4 = pnand %p652_p3, %p646_p0 }
   0xc   :  { %656 = shalt.err (!%p653_p4)
}
   0xd   :  { %s747_s29 = smov 64   ;;  %s748_s30 = smov 4  }
   0xe   :  { %39 = dma.hbm_to_vmem [thread:$0]  %s863_s1, 1024, %s34_s25, [#allocation6], %s747_s29, %s747_s29, %s748_s30  }
   0xf   :  { %s665_s10 = scalar_lea.vmem %s22_s27, 128  ;;  %p670_p6 = scmp.lt.s32.totalorder %s22_s27, %s22_s27 }
  0x10   :  { %p666_p5 = scmp.ne.s32.totalorder %s22_s27, %s665_s10  ;;  %p671_p7 = scmp.lt.s32.totalorder %s665_s10, %s665_s10 }
  0x12   :  { %p672_p8 = por %p671_p7, %p670_p6 }
  0x14   :  { %p673_p9 = pnand %p672_p8, %p666_p5 }
  0x16   :  { %676 = shalt.err (!%p673_p9)
}
  0x17   :  { %27 = dma.hbm_to_vmem [thread:$0]  %s862_s0, 128, %s22_s27, [#allocation3], %s747_s29, %s747_s29, %s748_s30  }
  0x18   :  { %s749_s13 = smov [#allocation7]   ;;  %s750_s15 = smov [#allocation8]  }
  0x19   :  { %s47_s14 = sshll.u32 %s749_s13, 4  ;;  %s61_s16 = sshll.u32 %s750_s15, 4  ;;  %s48_s14 = int_to_ptr.vmem [resolvable:$true] %s47_s14  ;;  %s62_s16 = int_to_ptr.vmem [resolvable:$true] %s61_s16 }
  0x1a   :  { %s685_s1 = scalar_lea.vmem %s48_s14, 1024  ;;  %p690_p11 = scmp.lt.s32.totalorder %s48_s14, %s48_s14 }
  0x1b   :  { %p686_p10 = scmp.ne.s32.totalorder %s48_s14, %s685_s1  ;;  %p691_p12 = scmp.lt.s32.totalorder %s685_s1, %s685_s1 }
  0x1d   :  { %p692_p13 = por %p691_p12, %p690_p11 }
  0x1f   :  { %p693_p0 = pnand %p692_p13, %p686_p10 }
  0x21   :  { %696 = shalt.err (!%p693_p0)
}
  0x22   :  { %53 = dma.hbm_to_vmem [thread:$0]  %s865_s3, 1024, %s48_s14, [#allocation6], %s747_s29, %s747_s29, %s748_s30  }
  0x23   :  { %s705_s0 = scalar_lea.vmem %s62_s16, 1024  ;;  %p710_p2 = scmp.lt.s32.totalorder %s62_s16, %s62_s16 }
  0x24   :  { %p706_p1 = scmp.ne.s32.totalorder %s62_s16, %s705_s0  ;;  %p711_p3 = scmp.lt.s32.totalorder %s705_s0, %s705_s0 }
  0x26   :  { %p712_p4 = por %p711_p3, %p710_p2 }
  0x28   :  { %p713_p5 = pnand %p712_p4, %p706_p1 }
  0x2a   :  { %716 = shalt.err (!%p713_p5)
}
  0x2b   :  { %67 = dma.hbm_to_vmem [thread:$0]  %s867_s5, 1024, %s62_s16, [#allocation9], %s747_s29, %s747_s29, %s748_s30  }
  0x2c   :  { %737 = dma.done.wait [#allocation3], 128  }
  0x2d   :  { %738 = vsyncadd [#allocation3], 4294967168 }
  0x2e   :  { %739 = dma.done.wait [#allocation6], 2048  }
  0x2f   :  { %740 = vsyncadd [#allocation6], 4294965248 }
  0x30   :  { %741 = dma.done.wait [#allocation9], 1024  }
  0x31   :  { %742 = vsyncadd [#allocation9], 4294966272  ;;  %v751_v0 = vmov 0.0   ;;  %vm752_vm0 = vmmov 0   ;;  %v604_v1 = vld [vmem:[#allocation5 + $0x38] sm:$0xff]   ;;  %v605_v2 = vld [vmem:[#allocation5 + $0x30] sm:$0xff]  }
  0x32   :  { %533 = vmatprep.subr.bf16.mxu0 %v751_v0  ;;  %549 = vmatprep.mubr.msk.bf16.mxu0 %vm752_vm0, %v751_v0  ;;  %v606_v3 = vld [vmem:[#allocation5 + $0x28] sm:$0xff]   ;;  %v613_v4 = vld [vmem:[#allocation7 + $0x38] sm:$0xff]   ;;  %v607_v5 = vld [vmem:[#allocation5 + $0x20] sm:$0xff]  }
  0x33   :  { %553 = vmatprep.subr.bf16.mxu1 %v751_v0  ;;  %569 = vmatprep.mubr.msk.bf16.mxu1 %vm752_vm0, %v751_v0  ;;  %v614_v6 = vld [vmem:[#allocation7 + $0x30] sm:$0xff]   ;;  %v608_v7 = vld [vmem:[#allocation5 + $0x18] sm:$0xff]   ;;  %v615_v8 = vld [vmem:[#allocation7 + $0x28] sm:$0xff]  }
  0x34   :  { %534 = vmatpush3.bf16.msra.mxu0 %v604_v1  ;;  %554 = vmatpush3.bf16.msra.mxu1 %v613_v4  ;;  %v609_v9 = vld [vmem:[#allocation5 + $0x10] sm:$0xff]   ;;  %v616_v10 = vld [vmem:[#allocation7 + $0x20] sm:$0xff]   ;;  %v610_v11 = vld [vmem:[#allocation5 + $0x8] sm:$0xff]  }
  0x35   :  { %535 = vmatprep.subr.bf16.mxu0 %v751_v0  ;;  %555 = vmatprep.subr.bf16.mxu1 %v751_v0  ;;  %v617_v12 = vld [vmem:[#allocation7 + $0x18] sm:$0xff]   ;;  %v611_v13 = vld [vmem:[#allocation5] sm:$0xff]   ;;  %v618_v15 = vld [vmem:[#allocation7 + $0x10] sm:$0xff]  }
  0x36   :  { %v612_v14 = vld [vmem:[#allocation2] sm:$0xff]   ;;  %v619_v16 = vld [vmem:[#allocation7 + $0x8] sm:$0xff]   ;;  %v620_v17 = vld [vmem:[#allocation7] sm:$0xff]  }
  0x37   :  { %v621_v18 = vld [vmem:[#allocation8 + $0x38] sm:$0xff]   ;;  %v622_v19 = vld [vmem:[#allocation8 + $0x30] sm:$0xff]   ;;  %v623_v20 = vld [vmem:[#allocation8 + $0x28] sm:$0xff]  }
  0x38   :  { %536 = vmatpush3.bf16.msra.mxu0 %v605_v2  ;;  %556 = vmatpush3.bf16.msra.mxu1 %v614_v6  ;;  %v624_v21 = vld [vmem:[#allocation8 + $0x20] sm:$0xff]   ;;  %v625_v22 = vld [vmem:[#allocation8 + $0x18] sm:$0xff]   ;;  %v626_v33 = vld [vmem:[#allocation8 + $0x10] sm:$0xff]  }
  0x39   :  { %537 = vmatprep.subr.bf16.mxu0 %v751_v0  ;;  %557 = vmatprep.subr.bf16.mxu1 %v751_v0  ;;  %v478_v23 = vld [vmem:[%s864_s2] ss:$0 sm:$0xff]  ;;  %v627_v34 = vld [vmem:[#allocation8 + $0x8] sm:$0xff]   ;;  %v628_v35 = vld [vmem:[#allocation8] sm:$0xff]  }
  0x3a   :  { %v488_v36 = vld [vmem:[%s866_s4] ss:$0 sm:$0xff]  ;;  %s753_s4 = smov [#allocation10]  }
  0x3b   :  { %v497_v46 = vld [vmem:[%s868_s6] ss:$0 sm:$0xff]  ;;  %s464_s6 = sshll.u32 %s753_s4, 4  ;;  %s465_s6 = int_to_ptr.vmem [resolvable:$true] %s464_s6 }
  0x3c   :  { %538 = vmatpush3.bf16.msra.mxu0 %v606_v3  ;;  %558 = vmatpush3.bf16.msra.mxu1 %v615_v8  ;;  %s717_s24 = scalar_lea.vmem %s465_s6, 256  ;;  %p722_p7 = scmp.lt.s32.totalorder %s465_s6, %s465_s6 }
  0x3d   :  { %539 = vmatprep.subr.bf16.mxu0 %v751_v0  ;;  %559 = vmatprep.subr.bf16.mxu1 %v751_v0  ;;  %p718_p6 = scmp.ne.s32.totalorder %s465_s6, %s717_s24  ;;  %p723_p8 = scmp.lt.s32.totalorder %s717_s24, %s717_s24 }
  0x3f   :  { %p724_p9 = por %p723_p8, %p722_p7 }
  0x40   :  { %540 = vmatpush3.bf16.msra.mxu0 %v607_v5  ;;  %560 = vmatpush3.bf16.msra.mxu1 %v616_v10 }
  0x41   :  { %541 = vmatprep.subr.bf16.mxu0 %v751_v0  ;;  %561 = vmatprep.subr.bf16.mxu1 %v751_v0  ;;  %p725_p10 = pnand %p724_p9, %p718_p6 }
  0x44   :  { %542 = vmatpush3.bf16.msra.mxu0 %v608_v7  ;;  %562 = vmatpush3.bf16.msra.mxu1 %v617_v12 }
  0x45   :  { %543 = vmatprep.subr.bf16.mxu0 %v751_v0  ;;  %563 = vmatprep.subr.bf16.mxu1 %v751_v0 }
  0x48   :  { %544 = vmatpush3.bf16.msra.mxu0 %v609_v9  ;;  %564 = vmatpush3.bf16.msra.mxu1 %v618_v15 }
  0x49   :  { %545 = vmatprep.subr.bf16.mxu0 %v751_v0  ;;  %565 = vmatprep.subr.bf16.mxu1 %v751_v0 }
  0x4c   :  { %546 = vmatpush3.bf16.msra.mxu0 %v610_v11  ;;  %566 = vmatpush3.bf16.msra.mxu1 %v619_v16 }
  0x4d   :  { %547 = vmatprep.subr.bf16.mxu0 %v751_v0  ;;  %567 = vmatprep.subr.bf16.mxu1 %v751_v0 }
  0x50   :  { %548 = vmatpush3.bf16.msra.mxu0 %v611_v13  ;;  %568 = vmatpush3.bf16.msra.mxu1 %v620_v17 }
  0x51   :  { %573 = vmatprep.subr.bf16.mxu0 %v751_v0 }
  0x53   :  { %550 = vmatmul.mubr.bf16.vlgmr.msra.gmra.mxu0 %v612_v14 }
  0x54   :  { %589 = vmatprep.mubr.msk.bf16.mxu0 %vm752_vm0, %v751_v0  ;;  %574 = vmatpush3.bf16.msra.mxu0 %v621_v18 }
  0x55   :  { %575 = vmatprep.subr.bf16.mxu0 %v751_v0 }
  0x58   :  { %576 = vmatpush3.bf16.msra.mxu0 %v622_v19 }
  0x59   :  { %577 = vmatprep.subr.bf16.mxu0 %v751_v0 }
  0x5c   :  { %578 = vmatpush3.bf16.msra.mxu0 %v623_v20 }
  0x5d   :  { %579 = vmatprep.subr.bf16.mxu0 %v751_v0 }
  0x60   :  { %580 = vmatpush3.bf16.msra.mxu0 %v624_v21 }
  0x61   :  { %581 = vmatprep.subr.bf16.mxu0 %v751_v0 }
  0x64   :  { %582 = vmatpush3.bf16.msra.mxu0 %v625_v22 }
  0x65   :  { %583 = vmatprep.subr.bf16.mxu0 %v751_v0 }
  0x68   :  { %584 = vmatpush3.bf16.msra.mxu0 %v626_v33 }
  0x69   :  { %585 = vmatprep.subr.bf16.mxu0 %v751_v0 }
  0x6c   :  { %586 = vmatpush3.bf16.msra.mxu0 %v627_v34 }
  0x6d   :  { %587 = vmatprep.subr.bf16.mxu0 %v751_v0 }
  0x70   :  { %588 = vmatpush3.bf16.msra.mxu0 %v628_v35 }
 0x113   :  { %v196_v24 = vpop.f32.mrf.mxu0 }
 0x114   :  { %v197_v26 = vadd.f32 %v478_v23, %v196_v24 }
 0x115   :  { %v551_v25 = vpop.f32.mrf.mxu0 }
 0x116   :  { %v203_v30 = vmax.f32 %v197_v26, 0.0 }
 0x117   :  { %v199_v27 = vpop.f32.mrf.mxu0 }
 0x118   :  { %v200_v28 = vadd.f32 %v478_v23, %v199_v27 }
 0x119   :  { %v552_v29 = vpop.f32.mrf.mxu0 }
 0x11a   :  { %v204_v31 = vmax.f32 %v200_v28, 0.0 }
 0x11c   :  { %v205_v32 = vpack.c.bf16 %v204_v31, %v203_v30 }
 0x11e   :  { %570 = vmatmul.mubr.bf16.vlgmr.msra.gmra.mxu1 %v205_v32 }
 0x1de   :  { %v311_v37 = vpop.f32.mrf.mxu1 }
 0x1df   :  { %v312_v39 = vadd.f32 %v488_v36, %v311_v37 }
 0x1e0   :  { %v571_v38 = vpop.f32.mrf.mxu1 }
 0x1e1   :  { %v318_v43 = vmax.f32 %v312_v39, 0.0 }
 0x1e2   :  { %v314_v40 = vpop.f32.mrf.mxu1 }
 0x1e3   :  { %v315_v41 = vadd.f32 %v488_v36, %v314_v40 }
 0x1e4   :  { %v572_v42 = vpop.f32.mrf.mxu1 }
 0x1e5   :  { %v319_v44 = vmax.f32 %v315_v41, 0.0 }
 0x1e7   :  { %v320_v45 = vpack.c.bf16 %v319_v44, %v318_v43 }
 0x1e9   :  { %590 = vmatmul.mubr.bf16.vlgmr.msra.gmra.mxu0 %v320_v45 }
 0x2a9   :  { %v426_v47 = vpop.f32.mrf.mxu0 }
 0x2aa   :  { %v427_v48 = vadd.f32 %v497_v46, %v426_v47 }
 0x2ab   :  { %v591_v49 = vpop.f32.mrf.mxu0 }
 0x2ac   :  { %433 = vmax.xlane.f32.xlu0 %v427_v48 }
 0x2ad   :  { %v429_v50 = vpop.f32.mrf.mxu0 }
 0x2ae   :  { %v430_v51 = vadd.f32 %v497_v46, %v429_v50 }
 0x2af   :  { %v592_v52 = vpop.f32.mrf.mxu0 }
 0x2b0   :  { %435 = vmax.xlane.f32.xlu0 %v430_v51 }
 0x335   :  { %v434_v53 = vpop.xlane.xlu0 %433 }
 0x336   :  { %v437_v54 = vsub.f32 %v427_v48, %v434_v53 }
 0x338   :  { %v439_v55 = vmul.f32 1.442695, %v437_v54 }
 0x339   :  { %v436_v56 = vpop.xlane.xlu0 %435 }
 0x33a   :  { %629 = vpow2.f32 %v439_v55  ;;  %v438_v57 = vsub.f32 %v430_v51, %v436_v56 }
 0x33c   :  { %v441_v58 = vmul.f32 1.442695, %v438_v57 }
 0x33e   :  { %631 = vpow2.f32 %v441_v58 }
 0x347   :  { %v630_v59 = vpop.eup %629 }
 0x348   :  { %443 = vadd.xlane.f32.xlu1 %v630_v59 }
 0x34b   :  { %v632_v60 = vpop.eup %631 }
 0x34c   :  { %445 = vadd.xlane.f32.xlu1 %v632_v60 }
 0x3d1   :  { %v444_v61 = vpop.xlane.xlu1 %443 }
 0x3d2   :  { %633 = vrcp.f32 %v444_v61 }
 0x3d5   :  { %v446_v62 = vpop.xlane.xlu1 %445 }
 0x3d6   :  { %635 = vrcp.f32 %v446_v62 }
 0x3df   :  { %v634_v63 = vpop.eup %633 }
 0x3e0   :  { %v449_v0 = vmul.f32 %v634_v63, %v444_v61 }
 0x3e2   :  { %v451_v1 = vsub.f32 2.0, %v449_v0 }
 0x3e3   :  { %v636_v2 = vpop.eup %635 }
 0x3e4   :  { %v453_v3 = vmul.f32 %v634_v63, %v451_v1  ;;  %v450_v4 = vmul.f32 %v636_v2, %v446_v62 }
 0x3e6   :  { %v455_v5 = vmul.f32 %v630_v59, %v453_v3  ;;  %v452_v6 = vsub.f32 2.0, %v450_v4 }
 0x3e8   :  { %457 = vst [vmem:[#allocation10] sm:$0xff] %v455_v5  ;;  %v454_v7 = vmul.f32 %v636_v2, %v452_v6 }
 0x3ea   :  { %v456_v8 = vmul.f32 %v632_v60, %v454_v7 }
 0x3ec   :  { %458 = vst [vmem:[#allocation10 + $0x8] sm:$0xff] %v456_v8 }
 0x3ed   :  { %728 = shalt.err (!%p725_p10)
}
 0x3ee   :  { %s754_s25 = smov 128   ;;  %s755_s26 = smov 8  }
 0x3ef   :  { %470 = dma.vmem_to_hbm [thread:$0]  %s465_s6, 256, %s869_s7, [#allocation4], %s754_s25, %s754_s25, %s755_s26  }
 0x3f0   :  { %743 = dma.done.wait [#allocation4], 256  }
 0x3f1   :  { %744 = vsyncadd [#allocation4], 4294967040 }
 0x3f2   :  { %474 = vsyncpa [#allocation3], 1 }
 0x3f3   :  { %475 = vsyncpa [#allocation6], 1 }
 0x3f4   :  { %476 = vsyncpa [#allocation9], 1 }
 0x3f5   :  { %477 = vsyncpa [#allocation4], 1 }

</bundles_post_ra>
